<compile_context>
chip_gen: v5e
topology: v5e:2x2
jax: 0.10.0
libtpu: 0.0.40
codegen_flags: <defaults>
</compile_context>

<pallas_src>
import functools

import jax
import jax.numpy as jnp
from jax.experimental import pallas as pl
from jax.experimental.pallas import tpu as pltpu


def _mha_kernel(qh_ref, khT_ref, vh_ref, wo_ref, bo_ref, o_ref, acc_ref):
    """One (batch, query-tile, head) grid step.

    qh_ref  : (1, 1, tq, dh) bf16   per-head query tile (softmax scale pre-folded)
    khT_ref : (1, 1, dh, T)  bf16   per-head keys, pre-transposed (no in-kernel kh.T)
    vh_ref  : (1, 1, T, dh)  bf16   per-head values
    wo_ref  : (1, dh, E)     bf16   per-head slice of the output projection
    bo_ref  : (1, E)         f32    output-projection bias
    o_ref   : (1, tq, E)            output tile
    acc_ref : (tq, E)        f32    scratch accumulator over the head axis
    """
    h = pl.program_id(2)

    @pl.when(h == 0)
    def _():
        acc_ref[...] = jnp.zeros_like(acc_ref)

    q = qh_ref[0, 0]                                   # (tq, dh) bf16
    kT = khT_ref[0, 0]                                 # (dh, T)  bf16
    v = vh_ref[0, 0]                                   # (T, dh)  bf16

    # Scores (scale already folded into the q projection in the wrapper).
    s = jnp.dot(q, kT, preferred_element_type=jnp.float32)          # (tq, T) f32
    s = s - jnp.max(s, axis=-1, keepdims=True)
    p = jnp.exp(s)                                                  # unnormalized
    denom = jnp.sum(p, axis=-1, keepdims=True)                      # (tq, 1) f32

    # PV matmul on the unnormalized probabilities, then normalize the small (tq, dh)
    # result instead of the large (tq, T) tile.
    ah = jnp.dot(p.astype(jnp.bfloat16), v,
                 preferred_element_type=jnp.float32)                # (tq, dh) f32
    ah = ah * pl.reciprocal(denom, approx=True)

    # This head's contribution to the output projection, accumulated in f32.
    acc_ref[...] += jnp.dot(ah.astype(jnp.bfloat16), wo_ref[0],
                            preferred_element_type=jnp.float32)     # (tq, E)

    @pl.when(h == pl.num_programs(2) - 1)
    def _():
        o_ref[0] = (acc_ref[...] + bo_ref[...]).astype(o_ref.dtype)


def prepare_attention_params(params, num_heads, embed_dim):
    """One-time weight preparation (scale folding, per-head layout, bf16 casts).

    Hoisted out of the forward path so the reshapes/transposes/casts are not re-emitted
    on every call.
    """
    E = embed_dim
    H = num_heads
    assert E % H == 0
    dh = E // H
    scale = 1.0 / float(dh) ** 0.5

    W = params["in_proj_weight"]                 # (3E, E) torch convention
    b = params["in_proj_bias"]                   # (3E,)
    Wo = params["out_proj_weight"]               # (E, E)
    bo = params["out_proj_bias"]                 # (E,)

    return {
        # q = x_q @ (Wq.T * scale) + bq * scale  -> softmax scale folded into Wq/bq.
        "wq_t": (W[:E].T * scale).astype(jnp.float32),          # (E, E)
        "bq": (b[:E] * scale).astype(jnp.float32),              # (E,)
        "wk_t": W[E:2 * E].T.astype(jnp.float32),               # (E, E)
        "bk": b[E:2 * E].astype(jnp.float32),                   # (E,)
        "wv_t": W[2 * E:].T.astype(jnp.float32),                # (E, E)
        "bv": b[2 * E:].astype(jnp.float32),                    # (E,)
        # out = sum_h attn_h @ (Wo.T)[h*dh:(h+1)*dh, :] + bo
        "wo_h": Wo.T.reshape(H, dh, E).astype(jnp.bfloat16),    # (H, dh, E)
        "bo": bo.reshape(1, E).astype(jnp.float32),             # (1, E)
    }


@functools.partial(jax.jit, static_argnames=("num_heads",))
def attention_forward(x, prepared, num_heads):
    """x: (B, T, 3*E) float32. Returns (B, T, E) multi-head attention output."""
    B, T, in_dim = x.shape
    assert in_dim % 3 == 0
    E = in_dim // 3
    H = num_heads
    assert E % H == 0
    dh = E // H

    tq = T if T <= 128 else 128
    # TODO(synk): general T needs query padding (and key masking for a padded KV axis).
    assert T % tq == 0, "sequence length must be a multiple of the query tile"
    nq = T // tq

    # ---- Full-width projections, done ONCE in XLA (no per-grid-step recompute). ----
    q_in = x[:, :, :E]
    k_in = x[:, :, E:2 * E]
    v_in = x[:, :, 2 * E:]
    qp = (q_in @ prepared["wq_t"] + prepared["bq"]).astype(jnp.bfloat16)   # (B, T, E)
    kp = (k_in @ prepared["wk_t"] + prepared["bk"]).astype(jnp.bfloat16)   # (B, T, E)
    vp = (v_in @ prepared["wv_t"] + prepared["bv"]).astype(jnp.bfloat16)   # (B, T, E)

    # Per-head layouts (bf16 cast done BEFORE the transposes). K is pre-transposed so
    # the kernel's score matmul needs no in-kernel transpose.
    qh = qp.reshape(B, T, H, dh).transpose(0, 2, 1, 3)    # (B, H, T, dh)
    khT = kp.reshape(B, T, H, dh).transpose(0, 2, 3, 1)   # (B, H, dh, T)
    vh = vp.reshape(B, T, H, dh).transpose(0, 2, 1, 3)    # (B, H, T, dh)

    wo_h = prepared["wo_h"]
    bo2 = prepared["bo"]

    # Explicit scoped-VMEM budget: double-buffered input/output blocks + accumulator,
    # with headroom (default scoped limits: 16 MiB v5e / 32 MiB v6e, v7x).
    blk_bytes = 2 * (tq * dh * 2 + dh * T * 2 + T * dh * 2 + dh * E * 2 + E * 4
                     + tq * E * x.dtype.itemsize) + tq * E * 4
    vmem_limit = int(min(max(3 * blk_bytes + (4 << 20), 16 << 20), 64 << 20))

    return pl.pallas_call(
        _mha_kernel,
        out_shape=jax.ShapeDtypeStruct((B, T, E), x.dtype),
        grid=(B, nq, H),
        in_specs=[
            pl.BlockSpec((1, 1, tq, dh), lambda bb, i, h: (bb, h, i, 0)),   # qh tile
            pl.BlockSpec((1, 1, dh, T), lambda bb, i, h: (bb, h, 0, 0)),    # khT (full len)
            pl.BlockSpec((1, 1, T, dh), lambda bb, i, h: (bb, h, 0, 0)),    # vh  (full len)
            pl.BlockSpec((1, dh, E), lambda bb, i, h: (h, 0, 0)),           # wo_h
            pl.BlockSpec((1, E), lambda bb, i, h: (0, 0)),                  # bo
        ],
        out_specs=pl.BlockSpec((1, tq, E), lambda bb, i, h: (bb, i, 0)),
        scratch_shapes=[pltpu.VMEM((tq, E), jnp.float32)],
        compiler_params=pltpu.CompilerParams(
            dimension_semantics=("parallel", "parallel", "arbitrary"),
            vmem_limit_bytes=vmem_limit),
    )(qh, khT, vh, wo_h, bo2)


def attention_reference(x, params, num_heads):
    """Pure-JAX (f32) replica of torch.nn.MultiheadAttention(batch_first=True) forward."""
    B, T, in_dim = x.shape
    E = in_dim // 3
    head_dim = E // num_heads
    scale = 1.0 / float(head_dim) ** 0.5

    W = params["in_proj_weight"]
    b = params["in_proj_bias"]
    q = x[:, :, :E] @ W[:E].T + b[:E]
    k = x[:, :, E:2 * E] @ W[E:2 * E].T + b[E:2 * E]
    v = x[:, :, 2 * E:] @ W[2 * E:].T + b[2 * E:]

    def to_heads(t):
        return t.reshape(B, T, num_heads, head_dim).transpose(0, 2, 1, 3)

    qh, kh, vh = to_heads(q) * scale, to_heads(k), to_heads(v)
    s = jnp.einsum("bhtd,bhsd->bhts", qh, kh)
    p = jax.nn.softmax(s, axis=-1)
    o = jnp.einsum("bhts,bhsd->bhtd", p, vh)
    o = o.transpose(0, 2, 1, 3).reshape(B, T, E)
    return o @ params["out_proj_weight"].T + params["out_proj_bias"]


if __name__ == "__main__":
    B, T, E, H = 2, 8, 32, 4   # input dim = 3*E = 96

    key = jax.random.PRNGKey(0)
    kx, kw, kb, kow, kob = jax.random.split(key, 5)

    x = jax.random.normal(kx, (B, T, 3 * E), dtype=jnp.float32)

    # Deterministic synthetic parameters (shapes match torch MultiheadAttention).
    params = {
        "in_proj_weight": jax.random.normal(kw, (3 * E, E), jnp.float32) * 0.1,
        "in_proj_bias": jax.random.normal(kb, (3 * E,), jnp.float32) * 0.1,
        "out_proj_weight": jax.random.normal(kow, (E, E), jnp.float32) * 0.1,
        "out_proj_bias": jax.random.normal(kob, (E,), jnp.float32) * 0.1,
    }

    # One-time weight preparation, hoisted out of the forward path.
    prepared = prepare_attention_params(params, num_heads=H, embed_dim=E)

    out = attention_forward(x, prepared, num_heads=H)
    out = jax.block_until_ready(out)

    ref = attention_reference(x, params, num_heads=H)
    assert out.shape == (B, T, E)
    # bf16 MXU inputs + approx reciprocal loosen numerics slightly vs. the f32 reference.
    max_err = jnp.max(jnp.abs(out - ref))
    assert jnp.allclose(out, ref, atol=2e-2, rtol=2e-2), f"max abs err {max_err}"

    print("KERNEL_OK")
</pallas_src>

<mosaic_0001>
module attributes {stable_mosaic.version = 11 : i64} {
  func.func @_mha_kernel(%arg0: i32, %arg1: i32, %arg2: i32, %arg3: memref<1x1x8x8xbf16, #tpu.memory_space<vmem>>, %arg4: memref<1x1x8x8xbf16, #tpu.memory_space<vmem>>, %arg5: memref<1x1x8x8xbf16, #tpu.memory_space<vmem>>, %arg6: memref<1x8x32xbf16, #tpu.memory_space<vmem>>, %arg7: memref<1x32xf32, #tpu.memory_space<vmem>>, %arg8: memref<1x8x32xf32, #tpu.memory_space<vmem>>, %arg9: memref<8x32xf32, #tpu.memory_space<vmem>>) attributes {dimension_semantics = [#tpu.dimension_semantics<parallel>, #tpu.dimension_semantics<parallel>, #tpu.dimension_semantics<arbitrary>], iteration_bounds = array<i64: 2, 1, 4>, scalar_prefetch = 0 : i64, scratch_operands = 1 : i64, tpu.core_type = #tpu.core_type<tc>, window_params = [{transform_indices = @transform_0, window_bounds = array<i64: 1, 1, 8, 8>}, {transform_indices = @transform_1, window_bounds = array<i64: 1, 1, 8, 8>}, {transform_indices = @transform_2, window_bounds = array<i64: 1, 1, 8, 8>}, {transform_indices = @transform_3, window_bounds = array<i64: 1, 8, 32>}, {pipeline_mode = #tpu.pipeline_mode<synchronous>, transform_indices = @transform_4, window_bounds = array<i64: 1, 32>}, {transform_indices = @transform_5, window_bounds = array<i64: 1, 8, 32>}]} {
    %c0_i32 = arith.constant 0 : i32
    %0 = arith.cmpi eq, %arg2, %c0_i32 : i32
    %1 = arith.extui %0 : i1 to i32
    %c0_i32_0 = arith.constant 0 : i32
    %2 = arith.cmpi ne, %1, %c0_i32_0 : i32
    scf.if %2 {
      %cst_24 = arith.constant 0.000000e+00 : f32
      %32 = vector.broadcast %cst_24 : f32 to vector<8x32xf32>
      %c0_25 = arith.constant 0 : index
      %c0_26 = arith.constant 0 : index
      %33 = vector.load %arg9[%c0_25, %c0_26] : memref<8x32xf32, #tpu.memory_space<vmem>>, vector<8x32xf32>
      tpu.vector_store %arg9[%c0_25, %c0_26], %32 {strides = array<i32>} : memref<8x32xf32, #tpu.memory_space<vmem>>, vector<8x32xf32>,
    } else {
    }
    %c0 = arith.constant 0 : index
    %c0_1 = arith.constant 0 : index
    %c0_2 = arith.constant 0 : index
    %c0_3 = arith.constant 0 : index
    %3 = vector.load %arg3[%c0, %c0_1, %c0_2, %c0_3] : memref<1x1x8x8xbf16, #tpu.memory_space<vmem>>, vector<1x1x8x8xbf16>
    %4 = vector.shape_cast %3 : vector<1x1x8x8xbf16> to vector<8x8xbf16>
    %c0_4 = arith.constant 0 : index
    %c0_5 = arith.constant 0 : index
    %c0_6 = arith.constant 0 : index
    %c0_7 = arith.constant 0 : index
    %5 = vector.load %arg4[%c0_4, %c0_5, %c0_6, %c0_7] : memref<1x1x8x8xbf16, #tpu.memory_space<vmem>>, vector<1x1x8x8xbf16>
    %6 = vector.shape_cast %5 : vector<1x1x8x8xbf16> to vector<8x8xbf16>
    %c0_8 = arith.constant 0 : index
    %c0_9 = arith.constant 0 : index
    %c0_10 = arith.constant 0 : index
    %c0_11 = arith.constant 0 : index
    %7 = vector.load %arg5[%c0_8, %c0_9, %c0_10, %c0_11] : memref<1x1x8x8xbf16, #tpu.memory_space<vmem>>, vector<1x1x8x8xbf16>
    %8 = vector.shape_cast %7 : vector<1x1x8x8xbf16> to vector<8x8xbf16>
    %cst = arith.constant dense<0.000000e+00> : vector<8x8xf32>
    %9 = tpu.matmul %4, %6, %cst {dimension_numbers = #tpu.dot_dimension_numbers<[1], [0], [0], [1], [0, 0, 1, 1], [], []>} : vector<8x8xbf16>, vector<8x8xbf16>, vector<8x8xf32> -> vector<8x8xf32>
    %cst_12 = arith.constant dense<0xFF800000> : vector<8xf32>
    %10 = vector.multi_reduction <maximumf>, %9, %cst_12 [1] : vector<8x8xf32> to vector<8xf32>
    %11 = vector.shape_cast %10 : vector<8xf32> to vector<8x1xf32>
    %12 = vector.broadcast %11 : vector<8x1xf32> to vector<8x8xf32>
    %13 = arith.subf %9, %12 : vector<8x8xf32>
    %14 = math.exp %13 : vector<8x8xf32>
    %cst_13 = arith.constant dense<0.000000e+00> : vector<8xf32>
    %15 = vector.multi_reduction <add>, %14, %cst_13 [1] : vector<8x8xf32> to vector<8xf32>
    %16 = vector.shape_cast %15 : vector<8xf32> to vector<8x1xf32>
    %17 = arith.truncf %14 : vector<8x8xf32> to vector<8x8xbf16>
    %cst_14 = arith.constant dense<0.000000e+00> : vector<8x8xf32>
    %18 = tpu.matmul %17, %8, %cst_14 {dimension_numbers = #tpu.dot_dimension_numbers<[1], [0], [0], [1], [0, 0, 1, 1], [], []>} : vector<8x8xbf16>, vector<8x8xbf16>, vector<8x8xf32> -> vector<8x8xf32>
    %19 = tpu.reciprocal %16 {approx = true} : vector<8x1xf32> -> vector<8x1xf32>
    %20 = vector.broadcast %19 : vector<8x1xf32> to vector<8x8xf32>
    %21 = arith.mulf %18, %20 : vector<8x8xf32>
    %c0_15 = arith.constant 0 : index
    %c0_16 = arith.constant 0 : index
    %22 = vector.load %arg9[%c0_15, %c0_16] : memref<8x32xf32, #tpu.memory_space<vmem>>, vector<8x32xf32>
    %23 = arith.truncf %21 : vector<8x8xf32> to vector<8x8xbf16>
    %c0_17 = arith.constant 0 : index
    %c0_18 = arith.constant 0 : index
    %c0_19 = arith.constant 0 : index
    %24 = vector.load %arg6[%c0_17, %c0_18, %c0_19] : memref<1x8x32xbf16, #tpu.memory_space<vmem>>, vector<1x8x32xbf16>
    %25 = vector.shape_cast %24 : vector<1x8x32xbf16> to vector<8x32xbf16>
    %cst_20 = arith.constant dense<0.000000e+00> : vector<8x32xf32>
    %26 = tpu.matmul %23, %25, %cst_20 {dimension_numbers = #tpu.dot_dimension_numbers<[1], [0], [0], [1], [0, 0, 1, 1], [], []>} : vector<8x8xbf16>, vector<8x32xbf16>, vector<8x32xf32> -> vector<8x32xf32>
    %27 = arith.addf %22, %26 : vector<8x32xf32>
    %c0_21 = arith.constant 0 : index
    %c0_22 = arith.constant 0 : index
    %28 = vector.load %arg9[%c0_21, %c0_22] : memref<8x32xf32, #tpu.memory_space<vmem>>, vector<8x32xf32>
    tpu.vector_store %arg9[%c0_21, %c0_22], %27 {strides = array<i32>} : memref<8x32xf32, #tpu.memory_space<vmem>>, vector<8x32xf32>,
    %c3_i32 = arith.constant 3 : i32
    %29 = arith.cmpi eq, %arg2, %c3_i32 : i32
    %30 = arith.extui %29 : i1 to i32
    %c0_i32_23 = arith.constant 0 : i32
    %31 = arith.cmpi ne, %30, %c0_i32_23 : i32
    scf.if %31 {
      %c0_24 = arith.constant 0 : index
      %c0_25 = arith.constant 0 : index
      %32 = vector.load %arg9[%c0_24, %c0_25] : memref<8x32xf32, #tpu.memory_space<vmem>>, vector<8x32xf32>
      %c0_26 = arith.constant 0 : index
      %c0_27 = arith.constant 0 : index
      %33 = vector.load %arg7[%c0_26, %c0_27] : memref<1x32xf32, #tpu.memory_space<vmem>>, vector<1x32xf32>
      %34 = vector.broadcast %33 : vector<1x32xf32> to vector<8x32xf32>
      %35 = arith.addf %32, %34 : vector<8x32xf32>
      %c0_28 = arith.constant 0 : index
      %c0_29 = arith.constant 0 : index
      %c0_30 = arith.constant 0 : index
      %36 = vector.load %arg8[%c0_28, %c0_29, %c0_30] : memref<1x8x32xf32, #tpu.memory_space<vmem>>, vector<1x8x32xf32>
      %37 = vector.shape_cast %36 : vector<1x8x32xf32> to vector<8x32xf32>
      %38 = vector.shape_cast %35 : vector<8x32xf32> to vector<1x8x32xf32>
      tpu.vector_store %arg8[%c0_28, %c0_29, %c0_30], %38 {strides = array<i32>} : memref<1x8x32xf32, #tpu.memory_space<vmem>>, vector<1x8x32xf32>,
    } else {
    }
    return
  }
  func.func @transform_0(%arg0: i32, %arg1: i32, %arg2: i32) -> (i32, i32, i32, i32) {
    %c0_i32 = arith.constant 0 : i32
    %c0_i32_0 = arith.constant 0 : i32
    return %arg0, %arg2, %arg1, %c0_i32 : i32, i32, i32, i32
  }
  func.func @transform_1(%arg0: i32, %arg1: i32, %arg2: i32) -> (i32, i32, i32, i32) {
    %c0_i32 = arith.constant 0 : i32
    %c0_i32_0 = arith.constant 0 : i32
    %c0_i32_1 = arith.constant 0 : i32
    return %arg0, %arg2, %c0_i32, %c0_i32_0 : i32, i32, i32, i32
  }
  func.func @transform_2(%arg0: i32, %arg1: i32, %arg2: i32) -> (i32, i32, i32, i32) {
    %c0_i32 = arith.constant 0 : i32
    %c0_i32_0 = arith.constant 0 : i32
    %c0_i32_1 = arith.constant 0 : i32
    return %arg0, %arg2, %c0_i32, %c0_i32_0 : i32, i32, i32, i32
  }
  func.func @transform_3(%arg0: i32, %arg1: i32, %arg2: i32) -> (i32, i32, i32) {
    %c0_i32 = arith.constant 0 : i32
    %c0_i32_0 = arith.constant 0 : i32
    %c0_i32_1 = arith.constant 0 : i32
    return %arg2, %c0_i32, %c0_i32_0 : i32, i32, i32
  }
  func.func @transform_4(%arg0: i32, %arg1: i32, %arg2: i32) -> (i32, i32) {
    %c0_i32 = arith.constant 0 : i32
    %c0_i32_0 = arith.constant 0 : i32
    %c0_i32_1 = arith.constant 0 : i32
    return %c0_i32, %c0_i32_0 : i32, i32
  }
  func.func @transform_5(%arg0: i32, %arg1: i32, %arg2: i32) -> (i32, i32, i32) {
    %c0_i32 = arith.constant 0 : i32
    %c0_i32_0 = arith.constant 0 : i32
    return %arg0, %arg1, %c0_i32 : i32, i32, i32
  }
}

</mosaic_0001>

<bundles_post_ra>
// kernel: attention_forward.1
= control target key start
LH: loop header
LB: loop body
LE: loop exit
PB: predicated region body
PF: predicated region fallthrough
CT: control target
= control target key end

     0   :  { %10 = vsyncpa [#allocation4], 0  ;;  %s972_s0 = inlined_call_operand.vmem [shape: bf16[2,4,8,8], index: 0, kind: input, shape index: {}]   ;;  %s973_s1 = inlined_call_operand.vmem [shape: bf16[2,4,8,8], index: 1, kind: input, shape index: {}]   ;;  %s974_s2 = inlined_call_operand.vmem [shape: bf16[2,4,8,8], index: 2, kind: input, shape index: {}]   ;;  %s975_s3 = inlined_call_operand.vmem [shape: bf16[4,8,32], index: 3, kind: input, shape index: {}]   ;;  %s976_s4 = inlined_call_operand.vmem [shape: f32[1,32], index: 4, kind: input, shape index: {}]   ;;  %s977_s5 = inlined_call_operand.hbm [shape: f32[2,8,32], index: 5, kind: output, shape index: {}]  }
   0x1   :  { %12 = vsyncpa [#allocation4 + $0x1], 0  ;;  %s817_s18 = smov 0   ;;  %s819_s19 = smov 0  }
   0x2   :  { %s821_s20 = smov 0   ;;  %s823_s21 = smov 0  }
   0x3   :  { %s825_s22 = smov 0   ;;  %s827_s23 = smov 0  }
   0x4   :  { %s829_s24 = smov 0   ;;  %s831_s25 = smov 0  }
   0x5 LB: > { %983 = sst [smem:[#allocation6_spill]] %s764_s20  ;;  %s591_s26 = sadd.s32 4294967295, %s784_s25   ;;  %s784_s25 = sphi %s831_s25, %s18_s25   ;;  %s780_s24 = sphi %s829_s24, %s997_s24   ;;  %s776_s23 = sphi %s827_s23, %s996_s23   ;;  %s772_s22 = sphi %s825_s22, %s995_s22   ;;  %s768_s21 = sphi %s823_s21, %s994_s21   ;;  %s764_s20 = sphi %s821_s20, %s993_s20   ;;  %s760_s19 = sphi %s819_s19, %s999_s19   ;;  %s756_s18 = sphi %s817_s18, %s998_s18  }
   0x6   : > { %984 = sst [smem:[#allocation7_spill]] %s776_s23  ;;  %s592_s27 = sadd.s32 4294967294, %s784_s25  }
   0x7   : > { %985 = sst [smem:[#allocation8_spill]] %s780_s24  ;;  %s30_s28 = sadd.s32 1, %s776_s23 }
   0x8   : > { %p31_p0 = scmp.ge.s32.totalorder %s30_s28, 4  ;;  %s37_s29 = sadd.s32 1, %s780_s24 }
   0x9   : > { %p189_p1 = scmp.ne.s32.totalorder %s764_s20, %s760_s19  ;;  %p190_p2 = scmp.eq.s32.totalorder %s591_s26, 7 }
   0xa   : > { %s1001_s28 = smov (%p31_p0, %s30_s28), 0  ;;  %s1003_s29 = smov (!%p31_p0, %s37_s29), %s780_s24 }
   0xb   : > { %986 = sst [smem:[#allocation9_spill]] %s1001_s28  ;;  %p866_p3 = por %p190_p2, %p189_p1 }
   0xc   : > { %p195_p4 = scmp.ne.s32.totalorder %s760_s19, %s756_s18  ;;  %p39_p5 = scmp.ge.s32.totalorder %s1003_s29, 2 }
   0xd   : > { %p196_p6 = scmp.eq.s32.totalorder %s592_s27, 7  ;;  %p595_p7 = scmp.ge.s32.totalorder %s784_s25, 1 }
   0xe   : > { %p260_p8 = scmp.lt.s32.totalorder %s784_s25, 9  ;;  %s1005_s29 = smov (%p39_p5, %s1003_s29), 0 }
   0xf   : > { %988 = sst [smem:[#allocation10_spill]] %s1005_s29  ;;  %p876_p9 = por %p196_p6, %p195_p4 }
  0x10   : > { %p261_p10 = pnand %p595_p7, %p260_p8  ;;  %s174_s7 = ssub.s32 %s780_s24, %s1005_s29 }
  0x11   : > { %s179_s8 = sadd.s32 1, %s764_s20  ;;  %p177_p11 = scmp.eq.s32.totalorder %s174_s7, 0 }
  0x12   : > { %264 = sbr.rel (%p261_p10) target bundleno = 583 (0x247), region = 40  ;;  %s980_s10 = sand.u32 (!%p261_p10), 1, %s760_s19  }
  0x13   : > { %s884_s9 = scalar_select %p177_p11, %s764_s20, %s179_s8  }
  0x14   : > { %p314_p12 = scmp.lt.s32.totalorder (!%p261_p10), %s772_s22, 1  ;;  %s890_s11 = sshll.u32 (!%p261_p10), %s980_s10, 3 }
  0x15   : > { %990 = sst [smem:[#allocation11_spill]] %s884_s9  ;;  %p316_p13 = scmp.lt.s32.totalorder (!%p261_p10), %s768_s21, 3 }
  0x16   : > { %p604_p0 = scmp.ne.s32.totalorder (!%p261_p10), %s768_s21, 0 }
  0x17   : > { %s315_s12 = scalar_select %p314_p12, %s772_s22, 1 }
  0x18   : > { %s317_s13 = scalar_select %p316_p13, %s768_s21, 3 }
  0x19   : > { %s597_s14 = sshll.u32 %s315_s12, 2  ;;  %349 = sbr.rel (%p604_p0) target bundleno = 32 (0x20), region = 44 }
  0x1a   : > { %s322_s15 = sadd.s32 %s597_s14, %s317_s13  ;;  %s603_s16 = sshll.u32 %s317_s13, 2 }
  0x1b   : > { %s598_s17 = sshll.u32 %s322_s15, 2  ;;  %s898_s7 = scalar_lea.vmem %s975_s3, %s603_s16 }
  0x1c   : > { %s324_s28 = scalar_lea.vmem %s972_s0, %s598_s17  ;;  %s332_s23 = scalar_lea.vmem %s973_s1, %s598_s17 }
  0x1d   : > { %s340_s12 = scalar_lea.vmem %s974_s2, %s598_s17  ;;  %s313_s14 = scalar_lea.vmem [#allocation3], %s890_s11 }
  0x1e   : > { %vm350_vm0 = vcmask 261120   ;;  %v786_v0 = vmov 0.0  }
  0x1f   : > { %351 = vst.msk [vmem:[#allocation2] sm:$0xff] %vm350_vm0, %v786_v0 }
  0x20 PF: > { %v353_v1 = vld [vmem:[%s332_s23] sm:$0xf]  ;;  %vm359_vm1 = vcmask 1043456   ;;  %vm355_vm2 = vcmask 64512   ;;  %vm430_vm3 = vcmask 261120   ;;  %p608_p1 = scmp.ne.s32.totalorder %s768_s21, 3 }
  0x21   : > { %v361_v2 = vsel %vm359_vm1, %v353_v1, 0  ;;  %v352_v3 = vld [vmem:[%s324_s28] sm:$0xf] }
  0x22   : > { %370 = vmatpush.bf16.msra.mxu0 %v361_v2  ;;  %v354_v7 = vld [vmem:[%s340_s12] sm:$0xf] }
  0x23   : > { %v390_v8 = vsel %vm359_vm1, %v354_v7, 0  ;;  %v409_v15 = vld [vmem:[%s898_s7] sm:$0xf] }
  0x24   : > { %399 = vmatpush.bf16.msra.mxu1 %v390_v8  ;;  %v414_v16 = vsel %vm359_vm1, %v409_v15, 0 }
  0x25   : > { %605 = vmatmul.msk.bf16.vlgmr.msra.gmra.mxu0 %vm355_vm2, %v352_v3  ;;  %423 = vmatpush.bf16.msra.mxu2 %v414_v16 }
  0x26   : > { %v407_v23 = vld [vmem:[#allocation2] sm:$0xff] }
  0xa2   : > { %v372_v4 = vpop.f32.mrf.mxu0 }
  0xa3   : > { %v376_v5 = vsel %vm355_vm2, %v372_v4, -inf }
  0xa4   : > { %377 = vmax.xlane.f32.xlu0 %v376_v5 }
  0xaa   : > { %v374_v6 = vpop.f32.mrf.mxu0 }
 0x117   : > { %v378_v9 = vpop.xlane.xlu0 %377 }
 0x118   : > { %v379_v10 = vsub.f32 %v372_v4, %v378_v9 }
 0x11a   : > { %v380_v11 = vmul.f32 1.442695, %v379_v10 }
 0x11c   : > { %685 = vpow2.f32 %v380_v11 }
 0x122   : > { %v686_v12 = vpop.eup %685 }
 0x123   : > { %v382_v13 = vsel %vm355_vm2, %v686_v12, 0.0  ;;  %v385_v14 = vpack.c.bf16 %v686_v12, %v686_v12 }
 0x124   : > { %383 = vadd.xlane.f32.xlu0 %v382_v13 }
 0x125   : > { %606 = vmatmul.msk.bf16.vlgmr.msra.gmra.mxu1 %vm355_vm2, %v385_v14 }
 0x197   : > { %v384_v17 = vpop.xlane.xlu0 %383 }
 0x198   : > { %687 = vrcp.f32 %v384_v17 }
 0x19e   : > { %v688_v18 = vpop.eup %687 }
 0x1a2   : > { %v401_v19 = vpop.f32.mrf.mxu1 }
 0x1a3   : > { %v406_v20 = vmul.f32 %v688_v18, %v401_v19 }
 0x1a5   : > { %v408_v21 = vpack.c.bf16 %v406_v20, %v406_v20 }
 0x1a7   : > { %607 = vmatmul.msk.bf16.vlgmr.msra.gmra.mxu2 %vm355_vm2, %v408_v21 }
 0x1aa   : > { %v403_v22 = vpop.f32.mrf.mxu1 }
 0x22a   : > { %v425_v24 = vpop.f32.mrf.mxu2 }
 0x22b   : > { %v429_v25 = vadd.f32 %v425_v24, %v407_v23 }
 0x22d   : > { %431 = vst.msk [vmem:[#allocation2] sm:$0xff] %vm430_vm3, %v429_v25 }
 0x22e   : > { %435 = sbr.rel (%p608_p1) target bundleno = 568 (0x238), region = 48 }
 0x232   : > { %v427_v26 = vpop.f32.mrf.mxu2 }
 0x233   : > { %v689_v28 = vld [vmem:[%s976_s4] ss:$0 sm:$0xff] }
 0x234   : > { %v436_v27 = vld [vmem:[#allocation2] sm:$0xff] }
 0x235   : > { %v441_v29 = vadd.f32 %v689_v28, %v436_v27 }
 0x237   : > { %442 = vst.msk [vmem:[%s313_s14] sm:$0xff] %vm430_vm3, %v441_v29 }
 0x238 PF: > { %s610_s24 = sshll.u32 %s772_s22, 3  ;;  %s457_s9 = sshll.u32 %s313_s14, 4  ;;  %s458_s9 = int_to_ptr.vmem [resolvable:$true] %s457_s9 }
 0x239   : > { %s455_s21 = scalar_lea.hbm %s977_s5, %s610_s24  ;;  %s991_s13 = sand.u32 1, %s760_s19  }
 0x23a   : > { %s459_s10 = sshll.u32 %s455_s21, 4  ;;  %s444_s15 = scalar_lea.sflag [#allocation4], %s991_s13  ;;  %s460_s10 = int_to_ptr.hbm [resolvable:$true] %s459_s10 }
 0x23b   : > { %s704_s16 = sshra.s32 %s460_s10, 4  ;;  %s710_s27 = scalar_lea.hbm %s977_s5, 16  ;;  %s705_s16 = int_to_ptr.hbm [resolvable:$true] %s704_s16 }
 0x23c   : > { %s706_s17 = scalar_lea.hbm %s705_s16, 8  ;;  %p711_p6 = scmp.lt.s32.totalorder %s705_s16, %s977_s5 }
 0x23d   : > { %p707_p2 = scmp.ne.s32.totalorder %s705_s16, %s706_s17  ;;  %p712_p7 = scmp.lt.s32.totalorder %s710_s27, %s706_s17 }
 0x23f   : > { %p708_p4 = pnand %p707_p2, %p866_p3  ;;  %p713_p8 = por %p712_p7, %p711_p6 }
 0x241   : > { %p709_p5 = pneg %p708_p4 }
 0x243   : > { %p714_p10 = pnand %p713_p8, %p709_p5 }
 0x245   : > { %717 = shalt.err (!%p714_p10)
}
 0x246   : > { %613 = dma.vmem_to_hbm [thread:$0]  (%p866_p3), %s458_s9, 128, %s460_s10, %s444_s15  }
 0x247 PF: > { %p619_p11 = scmp.ge.s32.totalorder %s784_s25, 2  ;;  %s471_s11 = sand.u32 1, %s756_s18  }
 0x248   : > { %s472_s12 = scalar_lea.sflag [#allocation4], %s471_s11 }
 0x249   : > { %p616_p12 = pnand %p619_p11, %p876_p9 }
 0x24b   : > { %p617_p13 = pneg %p616_p12 }
 0x24d   : > { %751 = dma.done.wait (%p617_p13), %s472_s12, 128  }
 0x24e   : > { %753 = vsyncadd (%p617_p13), %s472_s12, 4294967168  ;;  %s18_s25 = sadd.s32 1, %s784_s25   ;;  %s992_s14 = sld [smem:[#allocation6_spill]] }
 0x24f   : > { %p15_p0 = scmp.ge.s32.totalorder %s18_s25, 10   ;;  %s993_s20 = sld [smem:[#allocation11_spill]] }
 0x250   : > { %s994_s21 = sld [smem:[#allocation7_spill]]  ;;  %s998_s18 = smov %s760_s19 }
 0x251   : > { %s995_s22 = sld [smem:[#allocation8_spill]]  ;;  %17 = sbr.rel (!%p15_p0) target bundleno = 5 (0x5), region = 92 }
 0x252   : > { %s996_s23 = sld [smem:[#allocation9_spill]] }
 0x253   : > { %s997_s24 = sld [smem:[#allocation10_spill]] }
 0x254   : > { %s999_s19 = smov %s992_s14 }
 0x256   :  { %478 = vsyncpa [#allocation4], 1 }
 0x257   :  { %480 = vsyncpa [#allocation4 + $0x1], 1 }

</bundles_post_ra>
